<compile_context>
chip_gen: v7x
topology: tpu7x:2x2x1
jax: 0.10.0
libtpu: 0.0.40
codegen_flags: <defaults>
</compile_context>

<pallas_src>
import functools

import jax
import jax.numpy as jnp
from jax.experimental import pallas as pl
from jax.experimental.pallas import tpu as pltpu


def _round_up(x, m):
    return ((x + m - 1) // m) * m


def _ensemble_kernel(s_ref, a_ref, ns_ref,
                     w1s_ref, w1a_ref, w1ns_ref, b1_ref,
                     w2bd_ref, b2row_ref,
                     out_ref, *, num_members):
    f32 = jnp.float32

    # Fused hidden layer for ALL members at once: (tb, KH_pad) on the MXU,
    # f32 accumulation regardless of operand dtype.
    h = jnp.dot(s_ref[...], w1s_ref[...], preferred_element_type=f32)
    h = h + jnp.dot(a_ref[...], w1a_ref[...], preferred_element_type=f32)
    h = h + jnp.dot(ns_ref[...], w1ns_ref[...], preferred_element_type=f32)
    h = jnp.maximum(h + b1_ref[...], 0.0)            # bias + ReLU in f32 (VPU)

    # Block-diagonal output head on the MXU: r[:, k] = reward of member k for
    # k < K; padded lanes (k >= K) are exactly 0 (zero W2 columns + zero b2).
    r = jnp.dot(h.astype(w2bd_ref.dtype), w2bd_ref[...],
                preferred_element_type=f32)
    r = r + b2row_ref[...]                            # (tb, KP)

    inv_k = 1.0 / num_members
    inv_km1 = 1.0 / (num_members - 1)

    # Padded lanes contribute 0 to the sum, so dividing by K is exact.
    mean = jnp.sum(r, axis=-1, keepdims=True) * inv_k            # (tb, 1)

    # Two-pass ddof=1 variance; mask out padded lanes (they would contribute
    # (-mean)^2 otherwise).
    lane = jax.lax.broadcasted_iota(jnp.int32, r.shape, 1)
    diff = jnp.where(lane < num_members, r - mean, 0.0)
    var = jnp.sum(diff * diff, axis=-1, keepdims=True) * inv_km1  # (tb, 1)

    out_ref[...] = jnp.concatenate([mean, var], axis=-1)          # (tb, 2)


def reward_ensemble_moments(state, action, next_state, done, w1, b1, w2, b2,
                            *, matmul_dtype=jnp.float32):
    """Pallas implementation of RewardEnsemble.predict_reward_moments.

    Args:
      state, next_state: (B, obs_dim)
      action:            (B, act_dim)
      done:              (B,)
      w1: (K, D, H), b1: (K, H), w2: (K, H), b2: (K, 1) or (K,)
          stacked member MLP params, D = 2*obs_dim + act_dim + 1.
      matmul_dtype: dtype of the MXU operands (f32 for exactness, bf16 for
          native MXU rate / halved HBM read traffic); accumulation is f32.

    Returns:
      (mean, var): each (B,) float32, var uses ddof=1.
    """
    f32 = jnp.float32
    B, obs = state.shape
    _, act = action.shape
    K, D, H = w1.shape
    assert D == 2 * obs + act + 1
    assert K >= 2, "RewardEnsemble requires at least 2 members (ddof=1 variance)."

    KH = K * H
    KH_pad = _round_up(KH, 128)                 # lane-dense hidden width
    KP = _round_up(K, 128)                      # lane-dense head width

    # ---- weight prep (tiny, one-time) --------------------------------------
    # Fuse member weights: (K, D, H) -> (D, K*H), columns ordered (k, h);
    # zero-pad columns to KH_pad.
    w1_all = jnp.transpose(w1.astype(f32), (1, 0, 2)).reshape(D, KH)
    w1_all = jnp.pad(w1_all, ((0, 0), (0, KH_pad - KH)))
    w1_s = w1_all[:obs]                                            # (obs, KH_pad)
    # Fold the `done` feature row into the action block.
    w1_a = jnp.concatenate(
        [w1_all[obs:obs + act], w1_all[2 * obs + act:2 * obs + act + 1]], axis=0
    )                                                              # (act+1, KH_pad)
    w1_ns = w1_all[obs + act:2 * obs + act]                        # (obs, KH_pad)
    b1_row = jnp.pad(b1.reshape(1, KH).astype(f32), ((0, 0), (0, KH_pad - KH)))

    # Block-diagonal head: column k holds member k's w2 in rows [k*H, (k+1)*H).
    w2_bd = (w2.astype(f32)[:, :, None] *
             jnp.eye(K, dtype=f32)[:, None, :]).reshape(KH, K)
    w2_bd = jnp.pad(w2_bd, ((0, KH_pad - KH), (0, KP - K)))        # (KH_pad, KP)
    b2_row = jnp.pad(b2.reshape(1, K).astype(f32), ((0, 0), (0, KP - K)))

    # ---- input prep ---------------------------------------------------------
    action_aug = jnp.concatenate(
        [action.astype(f32), done.astype(f32)[:, None]], axis=-1)  # (B, act+1)

    mm = matmul_dtype
    state_m = state.astype(mm)
    action_m = action_aug.astype(mm)
    next_state_m = next_state.astype(mm)
    w1_s = w1_s.astype(mm)
    w1_a = w1_a.astype(mm)
    w1_ns = w1_ns.astype(mm)
    w2_bd = w2_bd.astype(mm)

    # Batch tiling: cap at 512 (vreg/VMEM friendly on v5e/v6e/v7x); pad tail.
    tb = min(512, max(_round_up(B, 8), 8))
    B_pad = _round_up(B, tb)
    if B_pad != B:
        pad = ((0, B_pad - B), (0, 0))
        state_m = jnp.pad(state_m, pad)
        action_m = jnp.pad(action_m, pad)
        next_state_m = jnp.pad(next_state_m, pad)
    nb = B_pad // tb

    out = pl.pallas_call(
        functools.partial(_ensemble_kernel, num_members=K),
        out_shape=jax.ShapeDtypeStruct((B_pad, 2), f32),
        grid_spec=pltpu.PrefetchScalarGridSpec(
            num_scalar_prefetch=0,
            grid=(nb,),
            in_specs=[
                pl.BlockSpec((tb, obs), lambda i: (i, 0)),          # state
                pl.BlockSpec((tb, act + 1), lambda i: (i, 0)),      # action ++ done
                pl.BlockSpec((tb, obs), lambda i: (i, 0)),          # next_state
                pl.BlockSpec((obs, KH_pad), lambda i: (0, 0)),      # W1 rows: state
                pl.BlockSpec((act + 1, KH_pad), lambda i: (0, 0)),  # W1 rows: action+done
                pl.BlockSpec((obs, KH_pad), lambda i: (0, 0)),      # W1 rows: next_state
                pl.BlockSpec((1, KH_pad), lambda i: (0, 0)),        # b1
                pl.BlockSpec((KH_pad, KP), lambda i: (0, 0)),       # block-diagonal W2
                pl.BlockSpec((1, KP), lambda i: (0, 0)),            # b2 row
            ],
            out_specs=pl.BlockSpec((tb, 2), lambda i: (i, 0)),
        ),
        compiler_params=pltpu.CompilerParams(
            dimension_semantics=("parallel",),   # batch axis shards across TCs (v7x)
            vmem_limit_bytes=32 * 1024 * 1024,
        ),
    )(state_m, action_m, next_state_m, w1_s, w1_a, w1_ns, b1_row, w2_bd, b2_row)

    return out[:B, 0], out[:B, 1]


def _reference_moments(state, action, next_state, done, w1, b1, w2, b2):
    x = jnp.concatenate([state, action, next_state, done[:, None]], axis=-1)
    h = jnp.maximum(
        jnp.einsum("bd,kdh->bkh", x, w1, precision=jax.lax.Precision.HIGHEST)
        + b1[None], 0.0)
    r = jnp.einsum("bkh,kh->bk", h, w2,
                   precision=jax.lax.Precision.HIGHEST) + b2.reshape(-1)[None]
    mean = r.mean(-1)
    var = r.var(-1, ddof=1)
    return mean, var


def _make_inputs(key, B, OBS, ACT, H, K):
    D = 2 * OBS + ACT + 1
    ks = jax.random.split(key, 8)
    state = jax.random.normal(ks[0], (B, OBS), jnp.float32)
    action = jax.random.normal(ks[1], (B, ACT), jnp.float32)
    next_state = jax.random.normal(ks[2], (B, OBS), jnp.float32)
    done = (jax.random.uniform(ks[3], (B,)) > 0.5).astype(jnp.float32)
    w1 = 0.1 * jax.random.normal(ks[4], (K, D, H), jnp.float32)
    b1 = 0.05 * jax.random.normal(ks[5], (K, H), jnp.float32)
    w2 = 0.1 * jax.random.normal(ks[6], (K, H), jnp.float32)
    b2 = 0.05 * jax.random.normal(ks[7], (K, 1), jnp.float32)
    return state, action, next_state, done, w1, b1, w2, b2


if __name__ == "__main__":
    key = jax.random.PRNGKey(0)
    k1, k2 = jax.random.split(key)

    # --- Small-shape exact (f32 MXU operands) check --------------------------
    B, OBS, ACT, H, K = 8, 16, 4, 32, 3
    args = _make_inputs(k1, B, OBS, ACT, H, K)
    mean, var = reward_ensemble_moments(*args)
    jax.block_until_ready((mean, var))
    ref_mean, ref_var = _reference_moments(*args)
    assert mean.shape == (B,) and var.shape == (B,)
    assert jnp.allclose(mean, ref_mean, atol=1e-4, rtol=1e-4)
    assert jnp.allclose(var, ref_var, atol=1e-4, rtol=1e-4)

    # --- Multi-tile grid + non-divisible batch (padded tail) check -----------
    B2, K2 = 1030, 4
    args2 = _make_inputs(k2, B2, OBS, ACT, H, K2)
    mean2, var2 = reward_ensemble_moments(*args2)
    jax.block_until_ready((mean2, var2))
    ref_mean2, ref_var2 = _reference_moments(*args2)
    assert mean2.shape == (B2,) and var2.shape == (B2,)
    assert jnp.allclose(mean2, ref_mean2, atol=1e-4, rtol=1e-4)
    assert jnp.allclose(var2, ref_var2, atol=1e-4, rtol=1e-4)

    # --- bf16 MXU operands (f32 accumulation), looser tolerance --------------
    mean_bf, var_bf = reward_ensemble_moments(*args, matmul_dtype=jnp.bfloat16)
    jax.block_until_ready((mean_bf, var_bf))
    assert jnp.allclose(mean_bf, ref_mean, atol=3e-2, rtol=3e-2)
    assert jnp.allclose(var_bf, ref_var, atol=3e-2, rtol=3e-2)

    print("KERNEL_OK")
</pallas_src>

<mosaic_0001>
module attributes {stable_mosaic.version = 11 : i64} {
  func.func @_ensemble_kernel(%arg0: i32, %arg1: memref<8x16xf32, #tpu.memory_space<vmem>>, %arg2: memref<8x5xf32, #tpu.memory_space<vmem>>, %arg3: memref<8x16xf32, #tpu.memory_space<vmem>>, %arg4: memref<16x128xf32, #tpu.memory_space<vmem>>, %arg5: memref<5x128xf32, #tpu.memory_space<vmem>>, %arg6: memref<16x128xf32, #tpu.memory_space<vmem>>, %arg7: memref<1x128xf32, #tpu.memory_space<vmem>>, %arg8: memref<128x128xf32, #tpu.memory_space<vmem>>, %arg9: memref<1x128xf32, #tpu.memory_space<vmem>>, %arg10: memref<8x2xf32, #tpu.memory_space<vmem>>) attributes {dimension_semantics = [#tpu.dimension_semantics<parallel>], iteration_bounds = array<i64: 1>, scalar_prefetch = 0 : i64, scratch_operands = 0 : i64, tpu.core_type = #tpu.core_type<tc>, window_params = [{transform_indices = @transform_0, window_bounds = array<i64: 8, 16>}, {transform_indices = @transform_1, window_bounds = array<i64: 8, 5>}, {transform_indices = @transform_2, window_bounds = array<i64: 8, 16>}, {pipeline_mode = #tpu.pipeline_mode<synchronous>, transform_indices = @transform_3, window_bounds = array<i64: 16, 128>}, {pipeline_mode = #tpu.pipeline_mode<synchronous>, transform_indices = @transform_4, window_bounds = array<i64: 5, 128>}, {pipeline_mode = #tpu.pipeline_mode<synchronous>, transform_indices = @transform_5, window_bounds = array<i64: 16, 128>}, {pipeline_mode = #tpu.pipeline_mode<synchronous>, transform_indices = @transform_6, window_bounds = array<i64: 1, 128>}, {pipeline_mode = #tpu.pipeline_mode<synchronous>, transform_indices = @transform_7, window_bounds = array<i64: 128, 128>}, {pipeline_mode = #tpu.pipeline_mode<synchronous>, transform_indices = @transform_8, window_bounds = array<i64: 1, 128>}, {transform_indices = @transform_9, window_bounds = array<i64: 8, 2>}]} {
    %c0 = arith.constant 0 : index
    %c0_0 = arith.constant 0 : index
    %0 = vector.load %arg1[%c0, %c0_0] : memref<8x16xf32, #tpu.memory_space<vmem>>, vector<8x16xf32>
    %c0_1 = arith.constant 0 : index
    %c0_2 = arith.constant 0 : index
    %1 = vector.load %arg4[%c0_1, %c0_2] : memref<16x128xf32, #tpu.memory_space<vmem>>, vector<16x128xf32>
    %cst = arith.constant dense<0.000000e+00> : vector<8x128xf32>
    %2 = tpu.matmul %0, %1, %cst {dimension_numbers = #tpu.dot_dimension_numbers<[1], [0], [0], [1], [0, 0, 1, 1], [], []>} : vector<8x16xf32>, vector<16x128xf32>, vector<8x128xf32> -> vector<8x128xf32>
    %c0_3 = arith.constant 0 : index
    %c0_4 = arith.constant 0 : index
    %3 = vector.load %arg2[%c0_3, %c0_4] : memref<8x5xf32, #tpu.memory_space<vmem>>, vector<8x5xf32>
    %c0_5 = arith.constant 0 : index
    %c0_6 = arith.constant 0 : index
    %4 = vector.load %arg5[%c0_5, %c0_6] : memref<5x128xf32, #tpu.memory_space<vmem>>, vector<5x128xf32>
    %cst_7 = arith.constant dense<0.000000e+00> : vector<8x128xf32>
    %5 = tpu.matmul %3, %4, %cst_7 {dimension_numbers = #tpu.dot_dimension_numbers<[1], [0], [0], [1], [0, 0, 1, 1], [], []>} : vector<8x5xf32>, vector<5x128xf32>, vector<8x128xf32> -> vector<8x128xf32>
    %6 = arith.addf %2, %5 : vector<8x128xf32>
    %c0_8 = arith.constant 0 : index
    %c0_9 = arith.constant 0 : index
    %7 = vector.load %arg3[%c0_8, %c0_9] : memref<8x16xf32, #tpu.memory_space<vmem>>, vector<8x16xf32>
    %c0_10 = arith.constant 0 : index
    %c0_11 = arith.constant 0 : index
    %8 = vector.load %arg6[%c0_10, %c0_11] : memref<16x128xf32, #tpu.memory_space<vmem>>, vector<16x128xf32>
    %cst_12 = arith.constant dense<0.000000e+00> : vector<8x128xf32>
    %9 = tpu.matmul %7, %8, %cst_12 {dimension_numbers = #tpu.dot_dimension_numbers<[1], [0], [0], [1], [0, 0, 1, 1], [], []>} : vector<8x16xf32>, vector<16x128xf32>, vector<8x128xf32> -> vector<8x128xf32>
    %10 = arith.addf %6, %9 : vector<8x128xf32>
    %c0_13 = arith.constant 0 : index
    %c0_14 = arith.constant 0 : index
    %11 = vector.load %arg7[%c0_13, %c0_14] : memref<1x128xf32, #tpu.memory_space<vmem>>, vector<1x128xf32>
    %12 = vector.broadcast %11 : vector<1x128xf32> to vector<8x128xf32>
    %13 = arith.addf %10, %12 : vector<8x128xf32>
    %cst_15 = arith.constant 0.000000e+00 : f32
    %14 = vector.broadcast %cst_15 : f32 to vector<8x128xf32>
    %15 = arith.maximumf %13, %14 : vector<8x128xf32>
    %c0_16 = arith.constant 0 : index
    %c0_17 = arith.constant 0 : index
    %16 = vector.load %arg8[%c0_16, %c0_17] : memref<128x128xf32, #tpu.memory_space<vmem>>, vector<128x128xf32>
    %cst_18 = arith.constant dense<0.000000e+00> : vector<8x128xf32>
    %17 = tpu.matmul %15, %16, %cst_18 {dimension_numbers = #tpu.dot_dimension_numbers<[1], [0], [0], [1], [0, 0, 1, 1], [], []>} : vector<8x128xf32>, vector<128x128xf32>, vector<8x128xf32> -> vector<8x128xf32>
    %c0_19 = arith.constant 0 : index
    %c0_20 = arith.constant 0 : index
    %18 = vector.load %arg9[%c0_19, %c0_20] : memref<1x128xf32, #tpu.memory_space<vmem>>, vector<1x128xf32>
    %19 = vector.broadcast %18 : vector<1x128xf32> to vector<8x128xf32>
    %20 = arith.addf %17, %19 : vector<8x128xf32>
    %cst_21 = arith.constant dense<0.000000e+00> : vector<8xf32>
    %21 = vector.multi_reduction <add>, %20, %cst_21 [1] : vector<8x128xf32> to vector<8xf32>
    %22 = vector.shape_cast %21 : vector<8xf32> to vector<8x1xf32>
    %cst_22 = arith.constant 0.333333343 : f32
    %23 = vector.broadcast %cst_22 : f32 to vector<8x1xf32>
    %24 = arith.mulf %22, %23 : vector<8x1xf32>
    %25 = tpu.iota {dimensions = array<i32: 1>} : vector<8x128xi32>
    %c3_i32 = arith.constant 3 : i32
    %26 = vector.broadcast %c3_i32 : i32 to vector<8x128xi32>
    %27 = arith.cmpi slt, %25, %26 : vector<8x128xi32>
    %28 = vector.broadcast %24 : vector<8x1xf32> to vector<8x128xf32>
    %29 = arith.subf %20, %28 : vector<8x128xf32>
    %cst_23 = arith.constant 0.000000e+00 : f32
    %30 = vector.broadcast %cst_23 : f32 to vector<8x128xf32>
    %31 = arith.select %27, %29, %30 : vector<8x128xi1>, vector<8x128xf32>
    %32 = arith.mulf %31, %31 : vector<8x128xf32>
    %cst_24 = arith.constant dense<0.000000e+00> : vector<8xf32>
    %33 = vector.multi_reduction <add>, %32, %cst_24 [1] : vector<8x128xf32> to vector<8xf32>
    %34 = vector.shape_cast %33 : vector<8xf32> to vector<8x1xf32>
    %cst_25 = arith.constant 5.000000e-01 : f32
    %35 = vector.broadcast %cst_25 : f32 to vector<8x1xf32>
    %36 = arith.mulf %34, %35 : vector<8x1xf32>
    %37 = tpu.concatenate %24, %36 in 1 : vector<8x1xf32>, vector<8x1xf32> -> vector<8x2xf32>
    %c0_26 = arith.constant 0 : index
    %c0_27 = arith.constant 0 : index
    %38 = vector.load %arg10[%c0_26, %c0_27] : memref<8x2xf32, #tpu.memory_space<vmem>>, vector<8x2xf32>
    tpu.vector_store %arg10[%c0_26, %c0_27], %37 {strides = array<i32>} : memref<8x2xf32, #tpu.memory_space<vmem>>, vector<8x2xf32>,
    return
  }
  func.func @transform_0(%arg0: i32) -> (i32, i32) {
    %c0_i32 = arith.constant 0 : i32
    %c0_i32_0 = arith.constant 0 : i32
    return %arg0, %c0_i32 : i32, i32
  }
  func.func @transform_1(%arg0: i32) -> (i32, i32) {
    %c0_i32 = arith.constant 0 : i32
    %c0_i32_0 = arith.constant 0 : i32
    return %arg0, %c0_i32 : i32, i32
  }
  func.func @transform_2(%arg0: i32) -> (i32, i32) {
    %c0_i32 = arith.constant 0 : i32
    %c0_i32_0 = arith.constant 0 : i32
    return %arg0, %c0_i32 : i32, i32
  }
  func.func @transform_3(%arg0: i32) -> (i32, i32) {
    %c0_i32 = arith.constant 0 : i32
    %c0_i32_0 = arith.constant 0 : i32
    %c0_i32_1 = arith.constant 0 : i32
    return %c0_i32, %c0_i32_0 : i32, i32
  }
  func.func @transform_4(%arg0: i32) -> (i32, i32) {
    %c0_i32 = arith.constant 0 : i32
    %c0_i32_0 = arith.constant 0 : i32
    %c0_i32_1 = arith.constant 0 : i32
    return %c0_i32, %c0_i32_0 : i32, i32
  }
  func.func @transform_5(%arg0: i32) -> (i32, i32) {
    %c0_i32 = arith.constant 0 : i32
    %c0_i32_0 = arith.constant 0 : i32
    %c0_i32_1 = arith.constant 0 : i32
    return %c0_i32, %c0_i32_0 : i32, i32
  }
  func.func @transform_6(%arg0: i32) -> (i32, i32) {
    %c0_i32 = arith.constant 0 : i32
    %c0_i32_0 = arith.constant 0 : i32
    %c0_i32_1 = arith.constant 0 : i32
    return %c0_i32, %c0_i32_0 : i32, i32
  }
  func.func @transform_7(%arg0: i32) -> (i32, i32) {
    %c0_i32 = arith.constant 0 : i32
    %c0_i32_0 = arith.constant 0 : i32
    %c0_i32_1 = arith.constant 0 : i32
    return %c0_i32, %c0_i32_0 : i32, i32
  }
  func.func @transform_8(%arg0: i32) -> (i32, i32) {
    %c0_i32 = arith.constant 0 : i32
    %c0_i32_0 = arith.constant 0 : i32
    %c0_i32_1 = arith.constant 0 : i32
    return %c0_i32, %c0_i32_0 : i32, i32
  }
  func.func @transform_9(%arg0: i32) -> (i32, i32) {
    %c0_i32 = arith.constant 0 : i32
    %c0_i32_0 = arith.constant 0 : i32
    return %arg0, %c0_i32 : i32, i32
  }
}

</mosaic_0001>

<bundles_post_ra>
// kernel: tpu_custom_call.1
= control target key start
LH: loop header
LB: loop body
LE: loop exit
PB: predicated region body
PF: predicated region fallthrough
CT: control target
= control target key end

     0   :  { %14 = vsyncpa [#allocation3], 0  ;;  %s904_s0 = inlined_call_operand.hbm [shape: f32[8,16], index: 0, kind: input, shape index: {}]   ;;  %s905_s1 = inlined_call_operand.hbm [shape: f32[8,5], index: 1, kind: input, shape index: {}]   ;;  %s906_s2 = inlined_call_operand.hbm [shape: f32[8,16], index: 2, kind: input, shape index: {}]   ;;  %s907_s3 = inlined_call_operand.hbm [shape: f32[16,128], index: 3, kind: input, shape index: {}]   ;;  %s908_s4 = inlined_call_operand.hbm [shape: f32[5,128], index: 4, kind: input, shape index: {}]   ;;  %s909_s5 = inlined_call_operand.vmem [shape: f32[16,128], index: 5, kind: input, shape index: {}]   ;;  %s910_s6 = inlined_call_operand.vmem [shape: f32[1,128], index: 6, kind: input, shape index: {}]   ;;  %s911_s7 = inlined_call_operand.hbm [shape: f32[128,128], index: 7, kind: input, shape index: {}]   ;;  %s912_s8 = inlined_call_operand.vmem [shape: f32[1,128], index: 8, kind: input, shape index: {}]   ;;  %s913_s9 = inlined_call_operand.vmem [shape: f32[8,2], index: 9, kind: output, shape index: {}]  }
   0x1   :  { %15 = vsyncpa [#allocation5], 0 }
   0x2   :  { %16 = vsyncpa [#allocation8], 0 }
   0x3   :  { %17 = vsyncpa [#allocation11], 0  ;;  %s732_s30 = smov [#allocation4]   ;;  %s733_s11 = smov [#allocation7]  }
   0x4   :  { %s34_s10 = sshll.u32 %s732_s30, 4  ;;  %s53_s12 = sshll.u32 %s733_s11, 4  ;;  %s35_s10 = int_to_ptr.vmem [resolvable:$true] %s34_s10  ;;  %s793_s12 = int_to_ptr.vmem [resolvable:$true] %s53_s12 }
   0x5   :  { %s592_s15 = scalar_lea.hbm %s905_s1, 128 }
   0x6   :  { %p593_p0 = scmp.ne.s32.totalorder %s905_s1, %s592_s15  ;;  %p596_p1 = scmp.lt.u32.totalorder %s592_s15, %s905_s1 }
   0x8   :  { %p598_p2 = pnand %p596_p1, %p593_p0 }
   0xa   :  { %601 = shalt.err (!%p598_p2)
}
   0xb   :  { %s602_s20 = scalar_lea.vmem %s35_s10, 128  ;;  %p607_p4 = scmp.lt.s32.totalorder %s35_s10, %s35_s10 }
   0xc   :  { %p603_p3 = scmp.ne.s32.totalorder %s35_s10, %s602_s20  ;;  %p608_p5 = scmp.lt.s32.totalorder %s602_s20, %s602_s20 }
   0xe   :  { %p609_p6 = por %p608_p5, %p607_p4 }
  0x10   :  { %p610_p7 = pnand %p609_p6, %p603_p3 }
  0x12   :  { %613 = shalt.err (!%p610_p7)
}
  0x13   :  { %37 = dma.hbm_to_vmem [thread:$0]  %s905_s1, 128, %s35_s10, [#allocation5]  }
  0x14   :  { %s614_s25 = scalar_lea.hbm %s907_s3, 256 }
  0x15   :  { %p615_p8 = scmp.ne.s32.totalorder %s907_s3, %s614_s25  ;;  %p618_p9 = scmp.lt.u32.totalorder %s614_s25, %s907_s3 }
  0x17   :  { %p620_p10 = pnand %p618_p9, %p615_p8 }
  0x19   :  { %623 = shalt.err (!%p620_p10)
}
  0x1a   :  { %s624_s30 = scalar_lea.vmem %s793_s12, 256  ;;  %p629_p12 = scmp.lt.s32.totalorder %s793_s12, %s793_s12 }
  0x1b   :  { %p625_p11 = scmp.ne.s32.totalorder %s793_s12, %s624_s30  ;;  %p630_p13 = scmp.lt.s32.totalorder %s624_s30, %s624_s30 }
  0x1d   :  { %p631_p0 = por %p630_p13, %p629_p12 }
  0x1f   :  { %p632_p1 = pnand %p631_p0, %p625_p11 }
  0x21   :  { %635 = shalt.err (!%p632_p1)
}
  0x22   :  { %s734_s1 = smov 128   ;;  %s735_s10 = smov 8  }
  0x23   :  { %59 = dma.hbm_to_vmem [thread:$0]  %s907_s3, 256, %s793_s12, [#allocation8], %s734_s1, %s734_s1, %s735_s10  }
  0x24   :  { %s736_s14 = smov [#allocation2]   ;;  %s737_s16 = smov [#allocation6]  }
  0x25   :  { %s24_s15 = sshll.u32 %s736_s14, 4  ;;  %s44_s17 = sshll.u32 %s737_s16, 4  ;;  %s25_s15 = int_to_ptr.vmem [resolvable:$true] %s24_s15  ;;  %s45_s17 = int_to_ptr.vmem [resolvable:$true] %s44_s17 }
  0x26   :  { %s636_s20 = scalar_lea.hbm %s904_s0, 128 }
  0x27   :  { %p637_p2 = scmp.ne.s32.totalorder %s904_s0, %s636_s20  ;;  %p640_p3 = scmp.lt.u32.totalorder %s636_s20, %s904_s0 }
  0x29   :  { %p642_p4 = pnand %p640_p3, %p637_p2 }
  0x2b   :  { %645 = shalt.err (!%p642_p4)
}
  0x2c   :  { %s646_s3 = scalar_lea.vmem %s25_s15, 128  ;;  %p651_p6 = scmp.lt.s32.totalorder %s25_s15, %s25_s15 }
  0x2d   :  { %p647_p5 = scmp.ne.s32.totalorder %s25_s15, %s646_s3  ;;  %p652_p7 = scmp.lt.s32.totalorder %s646_s3, %s646_s3 }
  0x2f   :  { %p653_p8 = por %p652_p7, %p651_p6 }
  0x31   :  { %p654_p9 = pnand %p653_p8, %p647_p5 }
  0x33   :  { %657 = shalt.err (!%p654_p9)
}
  0x34   :  { %27 = dma.hbm_to_vmem [thread:$0]  %s904_s0, 128, %s25_s15, [#allocation3]  }
  0x35   :  { %s658_s28 = scalar_lea.hbm %s906_s2, 128 }
  0x36   :  { %p659_p10 = scmp.ne.s32.totalorder %s906_s2, %s658_s28  ;;  %p662_p11 = scmp.lt.u32.totalorder %s658_s28, %s906_s2 }
  0x38   :  { %p664_p12 = pnand %p662_p11, %p659_p10 }
  0x3a   :  { %667 = shalt.err (!%p664_p12)
}
  0x3b   :  { %s668_s14 = scalar_lea.vmem %s45_s17, 128  ;;  %p673_p0 = scmp.lt.s32.totalorder %s45_s17, %s45_s17 }
  0x3c   :  { %p669_p13 = scmp.ne.s32.totalorder %s45_s17, %s668_s14  ;;  %p674_p1 = scmp.lt.s32.totalorder %s668_s14, %s668_s14 }
  0x3e   :  { %p675_p2 = por %p674_p1, %p673_p0 }
  0x40   :  { %p676_p3 = pnand %p675_p2, %p669_p13 }
  0x42   :  { %679 = shalt.err (!%p676_p3)
}
  0x43   :  { %47 = dma.hbm_to_vmem [thread:$0]  %s906_s2, 128, %s45_s17, [#allocation5]  }
  0x44   :  { %s738_s16 = smov [#allocation9]   ;;  %s739_s19 = smov [#allocation10]  }
  0x45   :  { %s66_s18 = sshll.u32 %s738_s16, 4  ;;  %s79_s20 = sshll.u32 %s739_s19, 4  ;;  %s67_s18 = int_to_ptr.vmem [resolvable:$true] %s66_s18  ;;  %s851_s20 = int_to_ptr.vmem [resolvable:$true] %s79_s20 }
  0x46   :  { %s680_s23 = scalar_lea.hbm %s908_s4, 128 }
  0x47   :  { %p681_p4 = scmp.ne.s32.totalorder %s908_s4, %s680_s23  ;;  %p684_p5 = scmp.lt.u32.totalorder %s680_s23, %s908_s4 }
  0x49   :  { %p686_p6 = pnand %p684_p5, %p681_p4 }
  0x4b   :  { %689 = shalt.err (!%p686_p6)
}
  0x4c   :  { %s690_s2 = scalar_lea.vmem %s67_s18, 128  ;;  %p695_p8 = scmp.lt.s32.totalorder %s67_s18, %s67_s18 }
  0x4d   :  { %p691_p7 = scmp.ne.s32.totalorder %s67_s18, %s690_s2  ;;  %p696_p9 = scmp.lt.s32.totalorder %s690_s2, %s690_s2 }
  0x4f   :  { %p697_p10 = por %p696_p9, %p695_p8 }
  0x51   :  { %p698_p11 = pnand %p697_p10, %p691_p7 }
  0x53   :  { %701 = shalt.err (!%p698_p11)
}
  0x54   :  { %69 = dma.hbm_to_vmem [thread:$0]  %s908_s4, 128, %s67_s18, [#allocation8]  }
  0x55   :  { %s702_s29 = scalar_lea.hbm %s911_s7, 2048 }
  0x56   :  { %p703_p12 = scmp.ne.s32.totalorder %s911_s7, %s702_s29  ;;  %p706_p13 = scmp.lt.u32.totalorder %s702_s29, %s911_s7 }
  0x58   :  { %p708_p0 = pnand %p706_p13, %p703_p12 }
  0x5a   :  { %711 = shalt.err (!%p708_p0)
}
  0x5b   :  { %s712_s0 = scalar_lea.vmem %s851_s20, 2048  ;;  %p717_p2 = scmp.lt.s32.totalorder %s851_s20, %s851_s20 }
  0x5c   :  { %p713_p1 = scmp.ne.s32.totalorder %s851_s20, %s712_s0  ;;  %p718_p3 = scmp.lt.s32.totalorder %s712_s0, %s712_s0 }
  0x5e   :  { %p719_p4 = por %p718_p3, %p717_p2 }
  0x60   :  { %p720_p5 = pnand %p719_p4, %p713_p1 }
  0x62   :  { %723 = shalt.err (!%p720_p5)
}
  0x63   :  { %85 = dma.hbm_to_vmem [thread:$0]  %s911_s7, 2048, %s851_s20, [#allocation11], %s734_s1, %s734_s1, %s735_s10  }
  0x64   :  { %724 = dma.done.wait [#allocation3], 128  }
  0x65   :  { %725 = vsyncadd [#allocation3], 4294967168 }
  0x66   :  { %726 = dma.done.wait [#allocation5], 256  }
  0x67   :  { %727 = vsyncadd [#allocation5], 4294967040 }
  0x68   :  { %728 = dma.done.wait [#allocation8], 384  }
  0x69   :  { %729 = vsyncadd [#allocation8], 4294966912 }
  0x6a   :  { %730 = dma.done.wait [#allocation11], 2048  }
  0x6b   :  { %731 = vsyncadd [#allocation11], 4294965248  ;;  %v740_v0 = vmov 0.0   ;;  %vm741_vm0 = vmmov 0   ;;  %v742_v1 = vmov 0.0|0.0   ;;  %vm115_vm1 = vcmask 1044480  }
  0x6c   :  { %497 = vmatprep.subr.mxu0 %v740_v0  ;;  %499 = vmatprep.mubr.msk.f32.mxu0 %vm741_vm0, %v740_v0  ;;  %vm111_vm2 = vcmask 39936   ;;  %v110_v2 = vld [vmem:[#allocation9] sm:$0x1f]  ;;  %v107_v4 = vld [vmem:[#allocation7] sm:$0xff]  ;;  %v108_v5 = vld [vmem:[#allocation7 + $0x8] sm:$0xff]  ;;  %vm189_vm3 = vcmask 130048   ;;  %v445_v51 = vlaneseq }
  0x6d   :  { %557 = vmatprep.subr.bf16.mxu1 %v742_v1  ;;  %548 = vmatprep.mubr.msk.f32.mxu1 %vm741_vm0, %v740_v0  ;;  %v109_v3 = vld [vmem:[#allocation4] sm:$0xff]  ;;  %v552_v7 = vpack.c.bf16 %v108_v5, %v107_v4  ;;  %v265_v8 = vld [vmem:[%s909_s5 + $0x8] sm:$0xff]  ;;  %v350_v10 = vld [vmem:[#allocation10 + $0x8] sm:$0xff]  ;;  %vm454_vm5 = vcmask 7168   ;;  %vm456_vm6 = vcmask 15360  }
  0x6e   :  { %498 = vmatpush3.msk.msra.mxu0 %vm115_vm1, %v110_v2  ;;  %v264_v6 = vld [vmem:[%s909_s5] sm:$0xff]  ;;  %v349_v9 = vld [vmem:[#allocation10] sm:$0xff]  ;;  %v351_v11 = vld [vmem:[#allocation10 + $0x10] sm:$0xff]  ;;  %v446_v52 = vand.u32 127, %v445_v51 }
  0x6f   :  { %500 = vmatmul.mubr.msk.f32.vlgmr.msra.gmra.mrb[0].mxu0 %vm111_vm2, %v109_v3  ;;  %551 = vmatprep.subr.bf16.mxu0 %v742_v1  ;;  %v352_v12 = vld [vmem:[#allocation10 + $0x18] sm:$0xff]  ;;  %v106_v13 = vld [vmem:[#allocation2] sm:$0xff]  ;;  %v555_v14 = vpack.c.bf16 %v265_v8, %v264_v6  ;;  %v558_v15 = vpack.c.bf16 %v350_v10, %v349_v9  ;;  %v353_v17 = vld [vmem:[#allocation10 + $0x20] sm:$0xff] }
  0x70   :  { %506 = vmatprep.mubr.msk.f32.mxu0 %vm741_vm0, %v740_v0  ;;  %553 = vmatpush3.bf16.msra.mxu0 %v552_v7  ;;  %v561_v16 = vpack.c.bf16 %v352_v12, %v351_v11  ;;  %v354_v18 = vld [vmem:[#allocation10 + $0x28] sm:$0xff]  ;;  %v263_v19 = vld [vmem:[#allocation6] sm:$0xff]  ;;  %v355_v21 = vld [vmem:[#allocation10 + $0x30] sm:$0xff]  ;;  %vm447_vm4 = vcmp.lt.s32.totalorder %v446_v52, 3 }
  0x71   :  { %554 = vmatprep.subr.bf16.mxu0 %v742_v1  ;;  %559 = vmatpush3.bf16.msra.mxu1 %v558_v15  ;;  %v564_v20 = vpack.c.bf16 %v354_v18, %v353_v17  ;;  %v356_v22 = vld [vmem:[#allocation10 + $0x38] sm:$0xff]  ;;  %v357_v24 = vld [vmem:[#allocation10 + $0x40] sm:$0xff]  ;;  %v358_v25 = vld [vmem:[#allocation10 + $0x48] sm:$0xff] }
  0x72   :  { %560 = vmatprep.subr.bf16.mxu1 %v742_v1  ;;  %v567_v23 = vpack.c.bf16 %v356_v22, %v355_v21  ;;  %v570_v26 = vpack.c.bf16 %v358_v25, %v357_v24  ;;  %v359_v27 = vld [vmem:[#allocation10 + $0x50] sm:$0xff]  ;;  %v360_v28 = vld [vmem:[#allocation10 + $0x58] sm:$0xff]  ;;  %v361_v30 = vld [vmem:[#allocation10 + $0x60] sm:$0xff] }
  0x73   :  { %507 = vmatmul.mubr.msk.f32.vlgmr.msra.gmra.mrb[2].mxu0 %vm189_vm3, %v106_v13  ;;  %v573_v29 = vpack.c.bf16 %v360_v28, %v359_v27  ;;  %v362_v31 = vld [vmem:[#allocation10 + $0x68] sm:$0xff]  ;;  %v363_v33 = vld [vmem:[#allocation10 + $0x70] sm:$0xff]  ;;  %v364_v34 = vld [vmem:[#allocation10 + $0x78] sm:$0xff] }
  0x74   :  { %556 = vmatpush3.bf16.msra.mxu0 %v555_v14  ;;  %513 = vmatprep.mubr.msk.f32.mxu0 %vm741_vm0, %v740_v0  ;;  %v576_v32 = vpack.c.bf16 %v362_v31, %v361_v30  ;;  %v579_v35 = vpack.c.bf16 %v364_v34, %v363_v33  ;;  %v470_v42 = vld [vmem:[%s910_s6] ss:$0 sm:$0xff] }
  0x75   :  { %562 = vmatpush3.bf16.msra.mxu1 %v561_v16  ;;  %v471_v47 = vld [vmem:[%s912_s8] ss:$0 sm:$0xff] }
  0x76   :  { %563 = vmatprep.subr.bf16.mxu1 %v742_v1 }
  0x77   :  { %514 = vmatmul.mubr.msk.f32.vlgmr.msra.gmra.mrb[4].mxu0 %vm189_vm3, %v263_v19 }
  0x79   :  { %565 = vmatpush3.bf16.msra.mxu1 %v564_v20 }
  0x7a   :  { %566 = vmatprep.subr.bf16.mxu1 %v742_v1 }
  0x7d   :  { %568 = vmatpush3.bf16.msra.mxu1 %v567_v23 }
  0x7e   :  { %569 = vmatprep.subr.bf16.mxu1 %v742_v1 }
  0x81   :  { %571 = vmatpush3.bf16.msra.mxu1 %v570_v26 }
  0x82   :  { %572 = vmatprep.subr.bf16.mxu1 %v742_v1 }
  0x85   :  { %574 = vmatpush3.bf16.msra.mxu1 %v573_v29 }
  0x86   :  { %575 = vmatprep.subr.bf16.mxu1 %v742_v1 }
  0x89   :  { %577 = vmatpush3.bf16.msra.mxu1 %v576_v32 }
  0x8a   :  { %578 = vmatprep.subr.bf16.mxu1 %v742_v1 }
  0x8d   :  { %580 = vmatpush3.bf16.msra.mxu1 %v579_v35 }
 0x142   :  { %v185_v36 = vpop.f32.mrb[0].mxu0 }
 0x143   :  { %v501_v37 = vpop.f32.mrb[1].mxu0 }
 0x146   :  { %v259_v38 = vpop.f32.mrb[2].mxu0 }
 0x147   :  { %v260_v39 = vadd.f32 %v259_v38, %v185_v36  ;;  %v508_v40 = vpop.f32.mrb[3].mxu0 }
 0x14a   :  { %v335_v41 = vpop.f32.mrb[4].mxu0 }
 0x14b   :  { %v339_v43 = vadd.f32 %v335_v41, %v260_v39  ;;  %v515_v44 = vpop.f32.mrb[5].mxu0 }
 0x14d   :  { %v347_v45 = vadd.f32 %v470_v42, %v339_v43 }
 0x14f   :  { %v348_v46 = vmax.f32 %v347_v45, 0.0 }
 0x151   :  { %549 = vmatmul.mubr.f32.vlgmr.msra.gmra.mrb[0].mxu1 %v348_v46 }
 0x224   :  { %v438_v48 = vpop.f32.mrb[0].mxu1 }
 0x225   :  { %v439_v49 = vadd.f32 %v471_v47, %v438_v48  ;;  %v550_v50 = vpop.f32.mrb[1].mxu1 }
 0x227   :  { %442 = vadd.xlane.f32.xlu0 %v439_v49 }
 0x2b4   :  { %v443_v53 = vpop.xlane.xlu0 %442 }
 0x2b5   :  { %v444_v54 = vmul.f32 0.33333334, %v443_v53 }
 0x2b7   :  { %v448_v55 = vsub.f32 %v439_v49, %v444_v54 }
 0x2b9   :  { %v449_v56 = vsel %vm447_vm4, %v448_v55, 0.0 }
 0x2ba   :  { %v450_v57 = vmul.f32 %v449_v56, %v449_v56 }
 0x2bc   :  { %451 = vadd.xlane.f32.xlu0 %v450_v57 }
 0x349   :  { %v452_v58 = vpop.xlane.xlu0 %451 }
 0x34a   :  { %v453_v59 = vmul.f32 0.5, %v452_v58 }
 0x34c   :  { %v455_v60 = vsel %vm454_vm5, %v444_v54, %v453_v59 }
 0x34d   :  { %457 = vst.msk [vmem:[%s913_s9] sm:$0xff] %vm456_vm6, %v455_v60 }
 0x34e   :  { %462 = vsyncpa [#allocation3], 1 }
 0x34f   :  { %463 = vsyncpa [#allocation5], 1 }
 0x350   :  { %464 = vsyncpa [#allocation8], 1 }
 0x351   :  { %465 = vsyncpa [#allocation11], 1 }

</bundles_post_ra>
